<compile_context>
chip_gen: v7x
topology: tpu7x:2x2x1
jax: 0.10.0
libtpu: 0.0.40
codegen_flags: <defaults>
</compile_context>

<pallas_src>
import functools

import jax
import jax.numpy as jnp
from jax.experimental import pallas as pl
from jax.experimental.pallas import tpu as pltpu


def _goal_decoder_kernel(C, W, x_ref, s_ref, o_ref):
    # x_ref : (N, C, HW) f32 VMEM  -- all batches, channels x flattened (H*W)
    # s_ref : (3*C + 2,) f32 SMEM  -- [w[:,k=0] | w[:,k=1] | w[:,k=2] | bias | alpha]
    # o_ref : (N, HW)    f32 VMEM
    HW = o_ref.shape[-1]

    # Boundary masks, built once from a single (1, HW) lane-index row.
    col = jax.lax.broadcasted_iota(jnp.int32, (1, HW), 1) % W
    mask_l = (col != 0).astype(jnp.float32)        # kill lanes where w == 0
    mask_r = (col != W - 1).astype(jnp.float32)    # kill lanes where w == W-1

    bias = s_ref[3 * C]
    alpha = s_ref[3 * C + 1]

    acc = jnp.zeros(o_ref.shape, jnp.float32)      # (N, HW) f32 accumulator
    for c in range(C):                             # static unroll, C is tiny
        xc = x_ref[:, c, :]                                      # (N, HW)
        # Shifted neighbours via XLU rolls; the mask-multiply zeroes exactly
        # the lanes where the roll wrapped across an H-row boundary, which is
        # the Conv2d zero padding of 1 along W.
        xl = pltpu.roll(xc, shift=1, axis=1) * mask_l            # x[..., w-1]
        xr = pltpu.roll(xc, shift=HW - 1, axis=1) * mask_r       # x[..., w+1]
        acc = (acc
               + xl * s_ref[c]                                   # tap k=0
               + xc * s_ref[C + c]                               # tap k=1
               + xr * s_ref[2 * C + c])                          # tap k=2

    acc = acc + bias
    o_ref[...] = jnp.where(acc > 0.0, acc, alpha * acc)          # PReLU


def goal_decoder_forward(x, conv_w, conv_b, prelu_alpha):
    """x: (N, C, H, W) f32; conv_w: (1, C, 1, 3); conv_b: (1,); prelu_alpha: (1,)."""
    N, C, H, W = x.shape
    HW = H * W

    x_flat = x.reshape(N, C, HW).astype(jnp.float32)
    # Flat scalar bank: [w(:,k=0), w(:,k=1), w(:,k=2), bias, alpha]
    scal = jnp.concatenate(
        [conv_w[0, :, 0, 0], conv_w[0, :, 0, 1], conv_w[0, :, 0, 2],
         conv_b.reshape(1), prelu_alpha.reshape(1)]
    ).astype(jnp.float32)

    out = pl.pallas_call(
        functools.partial(_goal_decoder_kernel, C, W),
        out_shape=jax.ShapeDtypeStruct((N, HW), jnp.float32),
        in_specs=[
            pl.BlockSpec(memory_space=pltpu.MemorySpace.VMEM),   # x: whole tensor, one block
            pl.BlockSpec(memory_space=pltpu.MemorySpace.SMEM),   # weights/bias/alpha scalars
        ],
        out_specs=pl.BlockSpec(memory_space=pltpu.MemorySpace.VMEM),
    )(x_flat, scal)

    # Conv output is (N, 1, H, W); PyTorch's .squeeze(0) drops dim 0 only when
    # N == 1 (static shape -> resolve in Python).
    out4 = out.reshape(N, 1, H, W)
    return out4[0] if N == 1 else out4


def _reference(x, conv_w, conv_b, prelu_alpha):
    # Pure-JAX (exact f32) reference for the same forward pass.
    N, C, H, W = x.shape
    xp = jnp.pad(x, ((0, 0), (0, 0), (0, 0), (1, 1)))
    acc = jnp.zeros((N, H, W), jnp.float32)
    for k in range(3):
        w_k = conv_w[0, :, 0, k].reshape(1, C, 1, 1)
        acc = acc + jnp.sum(xp[:, :, :, k:k + W] * w_k, axis=1)
    acc = acc + conv_b[0]
    acc = jnp.where(acc > 0.0, acc, prelu_alpha[0] * acc)
    out4 = acc[:, None, :, :]
    return out4[0] if N == 1 else out4


if __name__ == "__main__":
    obs_length = 4
    hidden_size = 32
    H, W = 8, 16            # H*W = 128 -> exactly one full lane width per output row

    key = jax.random.PRNGKey(0)
    k_x1, k_x2, k_cw, k_cb, k_mw, k_mb = jax.random.split(key, 6)

    conv_w = jax.random.normal(k_cw, (1, obs_length, 1, 3), dtype=jnp.float32) * 0.1
    conv_b = jax.random.normal(k_cb, (1,), dtype=jnp.float32) * 0.1
    prelu_alpha = jnp.full((1,), 0.25, dtype=jnp.float32)        # PReLU default init
    # self.MLP = Linear(2*hidden_size, 1) is declared but unused by forward().
    mlp_w = jax.random.normal(k_mw, (1, 2 * hidden_size), dtype=jnp.float32) * 0.02
    mlp_b = jax.random.normal(k_mb, (1,), dtype=jnp.float32) * 0.02
    del mlp_w, mlp_b  # never consumed by forward

    # Batch > 1: exercises the collapsed single-block (N, C, HW) path.
    x2 = jax.random.normal(k_x1, (2, obs_length, H, W), dtype=jnp.float32)
    out2 = jax.block_until_ready(goal_decoder_forward(x2, conv_w, conv_b, prelu_alpha))
    ref2 = _reference(x2, conv_w, conv_b, prelu_alpha)
    assert out2.shape == ref2.shape, (out2.shape, ref2.shape)
    assert jnp.allclose(out2, ref2, atol=1e-6, rtol=1e-6)

    # Batch == 1: exercises the .squeeze(0) path of the original forward.
    x1 = jax.random.normal(k_x2, (1, obs_length, H, W), dtype=jnp.float32)
    out1 = jax.block_until_ready(goal_decoder_forward(x1, conv_w, conv_b, prelu_alpha))
    ref1 = _reference(x1, conv_w, conv_b, prelu_alpha)
    assert out1.shape == ref1.shape, (out1.shape, ref1.shape)
    assert jnp.allclose(out1, ref1, atol=1e-6, rtol=1e-6)

    print("KERNEL_OK")
</pallas_src>

<mosaic_0001>
module attributes {stable_mosaic.version = 11 : i64} {
  func.func @_goal_decoder_kernel(%arg0: memref<2x4x128xf32, #tpu.memory_space<vmem>>, %arg1: memref<14xf32, #tpu.memory_space<smem>>, %arg2: memref<2x128xf32, #tpu.memory_space<vmem>>) attributes {dimension_semantics = [], scalar_prefetch = 0 : i64, scratch_operands = 0 : i64, tpu.core_type = #tpu.core_type<tc>} {
    %0 = tpu.iota {dimensions = array<i32: 1>} : vector<1x128xi32>
    %c16_i32 = arith.constant 16 : i32
    %c0_i32 = arith.constant 0 : i32
    %1 = arith.cmpi eq, %c16_i32, %c0_i32 : i32
    %c1_i32 = arith.constant 1 : i32
    %2 = arith.select %1, %c1_i32, %c16_i32 : i32
    %3 = vector.broadcast %2 : i32 to vector<1x128xi32>
    %4 = arith.remsi %0, %3 : vector<1x128xi32>
    %c0_i32_0 = arith.constant 0 : i32
    %5 = vector.broadcast %c0_i32_0 : i32 to vector<1x128xi32>
    %6 = arith.cmpi ne, %4, %5 : vector<1x128xi32>
    %c0_i32_1 = arith.constant 0 : i32
    %7 = vector.broadcast %c0_i32_1 : i32 to vector<1x128xi32>
    %8 = arith.cmpi slt, %4, %7 : vector<1x128xi32>
    %c0_i32_2 = arith.constant 0 : i32
    %9 = arith.cmpi slt, %2, %c0_i32_2 : i32
    %10 = vector.broadcast %9 : i1 to vector<1x128xi1>
    %11 = vector.broadcast %10 : vector<1x128xi1> to vector<1x128xi1>
    %12 = arith.xori %8, %11 : vector<1x128xi1>
    %13 = arith.andi %12, %6 : vector<1x128xi1>
    %14 = vector.broadcast %2 : i32 to vector<1x128xi32>
    %15 = arith.addi %4, %14 : vector<1x128xi32>
    %16 = arith.select %13, %15, %4 : vector<1x128xi1>, vector<1x128xi32>
    %c0_i32_3 = arith.constant 0 : i32
    %17 = vector.broadcast %c0_i32_3 : i32 to vector<1x128xi32>
    %18 = arith.cmpi ne, %16, %17 : vector<1x128xi32>
    %19 = arith.extui %18 : vector<1x128xi1> to vector<1x128xi32>
    %20 = arith.sitofp %19 : vector<1x128xi32> to vector<1x128xf32>
    %c15_i32 = arith.constant 15 : i32
    %21 = vector.broadcast %c15_i32 : i32 to vector<1x128xi32>
    %22 = arith.cmpi ne, %16, %21 : vector<1x128xi32>
    %23 = arith.extui %22 : vector<1x128xi1> to vector<1x128xi32>
    %24 = arith.sitofp %23 : vector<1x128xi32> to vector<1x128xf32>
    %c12 = arith.constant 12 : index
    %25 = memref.load %arg1[%c12] : memref<14xf32, #tpu.memory_space<smem>>
    %c13 = arith.constant 13 : index
    %26 = memref.load %arg1[%c13] : memref<14xf32, #tpu.memory_space<smem>>
    %cst = arith.constant 0.000000e+00 : f32
    %27 = vector.broadcast %cst : f32 to vector<2x128xf32>
    %c0 = arith.constant 0 : index
    %c0_4 = arith.constant 0 : index
    %c0_5 = arith.constant 0 : index
    %28 = vector.load %arg0[%c0, %c0_4, %c0_5] : memref<2x4x128xf32, #tpu.memory_space<vmem>>, vector<2x1x128xf32>
    %29 = vector.shape_cast %28 : vector<2x1x128xf32> to vector<2x128xf32>
    %c1_i32_6 = arith.constant 1 : i32
    %30 = tpu.dynamic_rotate %29 by %c1_i32_6 dim 1 : vector<2x128xf32>, i32 -> vector<2x128xf32>
    %31 = vector.broadcast %20 : vector<1x128xf32> to vector<2x128xf32>
    %32 = arith.mulf %30, %31 : vector<2x128xf32>
    %c127_i32 = arith.constant 127 : i32
    %33 = tpu.dynamic_rotate %29 by %c127_i32 dim 1 : vector<2x128xf32>, i32 -> vector<2x128xf32>
    %34 = vector.broadcast %24 : vector<1x128xf32> to vector<2x128xf32>
    %35 = arith.mulf %33, %34 : vector<2x128xf32>
    %c0_7 = arith.constant 0 : index
    %36 = memref.load %arg1[%c0_7] : memref<14xf32, #tpu.memory_space<smem>>
    %37 = vector.broadcast %36 : f32 to vector<2x128xf32>
    %38 = arith.mulf %32, %37 : vector<2x128xf32>
    %39 = arith.addf %27, %38 : vector<2x128xf32>
    %c4 = arith.constant 4 : index
    %40 = memref.load %arg1[%c4] : memref<14xf32, #tpu.memory_space<smem>>
    %41 = vector.broadcast %40 : f32 to vector<2x128xf32>
    %42 = arith.mulf %29, %41 : vector<2x128xf32>
    %43 = arith.addf %39, %42 : vector<2x128xf32>
    %c8 = arith.constant 8 : index
    %44 = memref.load %arg1[%c8] : memref<14xf32, #tpu.memory_space<smem>>
    %45 = vector.broadcast %44 : f32 to vector<2x128xf32>
    %46 = arith.mulf %35, %45 : vector<2x128xf32>
    %47 = arith.addf %43, %46 : vector<2x128xf32>
    %c0_8 = arith.constant 0 : index
    %c1 = arith.constant 1 : index
    %c0_9 = arith.constant 0 : index
    %48 = vector.load %arg0[%c0_8, %c1, %c0_9] : memref<2x4x128xf32, #tpu.memory_space<vmem>>, vector<2x1x128xf32>
    %49 = vector.shape_cast %48 : vector<2x1x128xf32> to vector<2x128xf32>
    %c1_i32_10 = arith.constant 1 : i32
    %50 = tpu.dynamic_rotate %49 by %c1_i32_10 dim 1 : vector<2x128xf32>, i32 -> vector<2x128xf32>
    %51 = vector.broadcast %20 : vector<1x128xf32> to vector<2x128xf32>
    %52 = arith.mulf %50, %51 : vector<2x128xf32>
    %c127_i32_11 = arith.constant 127 : i32
    %53 = tpu.dynamic_rotate %49 by %c127_i32_11 dim 1 : vector<2x128xf32>, i32 -> vector<2x128xf32>
    %54 = vector.broadcast %24 : vector<1x128xf32> to vector<2x128xf32>
    %55 = arith.mulf %53, %54 : vector<2x128xf32>
    %c1_12 = arith.constant 1 : index
    %56 = memref.load %arg1[%c1_12] : memref<14xf32, #tpu.memory_space<smem>>
    %57 = vector.broadcast %56 : f32 to vector<2x128xf32>
    %58 = arith.mulf %52, %57 : vector<2x128xf32>
    %59 = arith.addf %47, %58 : vector<2x128xf32>
    %c5 = arith.constant 5 : index
    %60 = memref.load %arg1[%c5] : memref<14xf32, #tpu.memory_space<smem>>
    %61 = vector.broadcast %60 : f32 to vector<2x128xf32>
    %62 = arith.mulf %49, %61 : vector<2x128xf32>
    %63 = arith.addf %59, %62 : vector<2x128xf32>
    %c9 = arith.constant 9 : index
    %64 = memref.load %arg1[%c9] : memref<14xf32, #tpu.memory_space<smem>>
    %65 = vector.broadcast %64 : f32 to vector<2x128xf32>
    %66 = arith.mulf %55, %65 : vector<2x128xf32>
    %67 = arith.addf %63, %66 : vector<2x128xf32>
    %c0_13 = arith.constant 0 : index
    %c2 = arith.constant 2 : index
    %c0_14 = arith.constant 0 : index
    %68 = vector.load %arg0[%c0_13, %c2, %c0_14] : memref<2x4x128xf32, #tpu.memory_space<vmem>>, vector<2x1x128xf32>
    %69 = vector.shape_cast %68 : vector<2x1x128xf32> to vector<2x128xf32>
    %c1_i32_15 = arith.constant 1 : i32
    %70 = tpu.dynamic_rotate %69 by %c1_i32_15 dim 1 : vector<2x128xf32>, i32 -> vector<2x128xf32>
    %71 = vector.broadcast %20 : vector<1x128xf32> to vector<2x128xf32>
    %72 = arith.mulf %70, %71 : vector<2x128xf32>
    %c127_i32_16 = arith.constant 127 : i32
    %73 = tpu.dynamic_rotate %69 by %c127_i32_16 dim 1 : vector<2x128xf32>, i32 -> vector<2x128xf32>
    %74 = vector.broadcast %24 : vector<1x128xf32> to vector<2x128xf32>
    %75 = arith.mulf %73, %74 : vector<2x128xf32>
    %c2_17 = arith.constant 2 : index
    %76 = memref.load %arg1[%c2_17] : memref<14xf32, #tpu.memory_space<smem>>
    %77 = vector.broadcast %76 : f32 to vector<2x128xf32>
    %78 = arith.mulf %72, %77 : vector<2x128xf32>
    %79 = arith.addf %67, %78 : vector<2x128xf32>
    %c6 = arith.constant 6 : index
    %80 = memref.load %arg1[%c6] : memref<14xf32, #tpu.memory_space<smem>>
    %81 = vector.broadcast %80 : f32 to vector<2x128xf32>
    %82 = arith.mulf %69, %81 : vector<2x128xf32>
    %83 = arith.addf %79, %82 : vector<2x128xf32>
    %c10 = arith.constant 10 : index
    %84 = memref.load %arg1[%c10] : memref<14xf32, #tpu.memory_space<smem>>
    %85 = vector.broadcast %84 : f32 to vector<2x128xf32>
    %86 = arith.mulf %75, %85 : vector<2x128xf32>
    %87 = arith.addf %83, %86 : vector<2x128xf32>
    %c0_18 = arith.constant 0 : index
    %c3 = arith.constant 3 : index
    %c0_19 = arith.constant 0 : index
    %88 = vector.load %arg0[%c0_18, %c3, %c0_19] : memref<2x4x128xf32, #tpu.memory_space<vmem>>, vector<2x1x128xf32>
    %89 = vector.shape_cast %88 : vector<2x1x128xf32> to vector<2x128xf32>
    %c1_i32_20 = arith.constant 1 : i32
    %90 = tpu.dynamic_rotate %89 by %c1_i32_20 dim 1 : vector<2x128xf32>, i32 -> vector<2x128xf32>
    %91 = vector.broadcast %20 : vector<1x128xf32> to vector<2x128xf32>
    %92 = arith.mulf %90, %91 : vector<2x128xf32>
    %c127_i32_21 = arith.constant 127 : i32
    %93 = tpu.dynamic_rotate %89 by %c127_i32_21 dim 1 : vector<2x128xf32>, i32 -> vector<2x128xf32>
    %94 = vector.broadcast %24 : vector<1x128xf32> to vector<2x128xf32>
    %95 = arith.mulf %93, %94 : vector<2x128xf32>
    %c3_22 = arith.constant 3 : index
    %96 = memref.load %arg1[%c3_22] : memref<14xf32, #tpu.memory_space<smem>>
    %97 = vector.broadcast %96 : f32 to vector<2x128xf32>
    %98 = arith.mulf %92, %97 : vector<2x128xf32>
    %99 = arith.addf %87, %98 : vector<2x128xf32>
    %c7 = arith.constant 7 : index
    %100 = memref.load %arg1[%c7] : memref<14xf32, #tpu.memory_space<smem>>
    %101 = vector.broadcast %100 : f32 to vector<2x128xf32>
    %102 = arith.mulf %89, %101 : vector<2x128xf32>
    %103 = arith.addf %99, %102 : vector<2x128xf32>
    %c11 = arith.constant 11 : index
    %104 = memref.load %arg1[%c11] : memref<14xf32, #tpu.memory_space<smem>>
    %105 = vector.broadcast %104 : f32 to vector<2x128xf32>
    %106 = arith.mulf %95, %105 : vector<2x128xf32>
    %107 = arith.addf %103, %106 : vector<2x128xf32>
    %108 = vector.broadcast %25 : f32 to vector<2x128xf32>
    %109 = arith.addf %107, %108 : vector<2x128xf32>
    %cst_23 = arith.constant 0.000000e+00 : f32
    %110 = vector.broadcast %cst_23 : f32 to vector<2x128xf32>
    %111 = arith.cmpf ogt, %109, %110 : vector<2x128xf32>
    %112 = vector.broadcast %26 : f32 to vector<2x128xf32>
    %113 = arith.mulf %112, %109 : vector<2x128xf32>
    %114 = arith.select %111, %109, %113 : vector<2x128xi1>, vector<2x128xf32>
    %c0_24 = arith.constant 0 : index
    %c0_25 = arith.constant 0 : index
    %115 = vector.load %arg2[%c0_24, %c0_25] : memref<2x128xf32, #tpu.memory_space<vmem>>, vector<2x128xf32>
    tpu.vector_store %arg2[%c0_24, %c0_25], %114 {strides = array<i32>} : memref<2x128xf32, #tpu.memory_space<vmem>>, vector<2x128xf32>,
    return
  }
}

</mosaic_0001>

<bundles_post_ra>
// kernel: tpu_custom_call.1
= control target key start
LH: loop header
LB: loop body
LE: loop exit
PB: predicated region body
PF: predicated region fallthrough
CT: control target
= control target key end

     0   :  { %7 = vsyncpa [#allocation3], 0  ;;  %s356_s0 = inlined_call_operand.hbm [shape: f32[2,4,128], index: 0, kind: input, shape index: {}]   ;;  %s357_s1 = inlined_call_operand.vmem [shape: f32[14], index: 1, kind: input, shape index: {}]   ;;  %s358_s2 = inlined_call_operand.hbm [shape: f32[2,128], index: 2, kind: output, shape index: {}]  }
   0x1   :  { %8 = vsyncpa [#allocation5], 0 }
   0x2   :  { %9 = vsyncpa [#allocation4], 0  ;;  %s294_s9 = smov [#allocation2]   ;;  %s28_s13 = sshll.u32 %s357_s1, 4  ;;  %s29_s13 = int_to_ptr.vmem [resolvable:$true] %s28_s13 }
   0x3   :  { %s15_s10 = sshll.u32 %s294_s9, 4  ;;  %s232_s16 = scalar_lea.hbm %s356_s0, 128  ;;  %s16_s10 = int_to_ptr.vmem [resolvable:$true] %s15_s10 }
   0x4   :  { %p233_p0 = scmp.ne.s32.totalorder %s356_s0, %s232_s16  ;;  %p236_p1 = scmp.lt.u32.totalorder %s232_s16, %s356_s0 }
   0x6   :  { %p238_p2 = pnand %p236_p1, %p233_p0 }
   0x8   :  { %241 = shalt.err (!%p238_p2)
}
   0x9   :  { %s242_s21 = scalar_lea.vmem %s16_s10, 128  ;;  %p247_p4 = scmp.lt.s32.totalorder %s16_s10, %s16_s10 }
   0xa   :  { %p243_p3 = scmp.ne.s32.totalorder %s16_s10, %s242_s21  ;;  %p248_p5 = scmp.lt.s32.totalorder %s242_s21, %s242_s21 }
   0xc   :  { %p249_p6 = por %p248_p5, %p247_p4 }
   0xe   :  { %p250_p7 = pnand %p249_p6, %p243_p3 }
  0x10   :  { %253 = shalt.err (!%p250_p7)
}
  0x11   :  { %s295_s1 = smov 64   ;;  %s296_s22 = smov 4  }
  0x12   :  { %21 = dma.hbm_to_vmem [thread:$0]  %s356_s0, 128, %s16_s10, [#allocation3], %s295_s1, %s295_s1, %s296_s22  }
  0x13   :  { %s254_s25 = scalar_lea.vmem %s29_s13, 16  ;;  %p259_p9 = scmp.lt.s32.totalorder %s29_s13, %s29_s13 }
  0x14   :  { %p255_p8 = scmp.ne.s32.totalorder %s29_s13, %s254_s25  ;;  %p260_p10 = scmp.lt.s32.totalorder %s254_s25, %s254_s25 }
  0x16   :  { %p261_p11 = por %p260_p10, %p259_p9 }
  0x18   :  { %p262_p12 = pnand %p261_p11, %p255_p8 }
  0x1a   :  { %265 = shalt.err (!%p262_p12)
}
  0x1b   :  { %s297_s26 = smov [#allocation6]  }
  0x1c   :  { %31 = dma.vmem_to_smem %s29_s13, 16, %s297_s26, [#allocation5]  }
  0x1d   :  { %288 = dma.done.wait [#allocation3], 128  }
  0x1e   :  { %289 = vsyncadd [#allocation3], 4294967168 }
  0x1f   :  { %290 = dma.done.wait [#allocation5], 16  }
  0x20   :  { %291 = vsyncadd [#allocation5], 4294967280 }
  0x21   :  { %38 = sfence }
  0x22   :  { %v61_v0 = vld [vmem:[#allocation2] sm:$0x1]  ;;  %v62_v1 = vld [vmem:[#allocation2 + $0x4] sm:$0x1]  ;;  %vm66_vm0 = vcmask 1041409   ;;  %s213_s0 = sld [smem:[#allocation6 + $0x4]]  ;;  %v39_v36 = vlaneseq }
  0x23   :  { %v65_v2 = vrot.slane %v62_v1, 7  ;;  %v93_v3 = vld [vmem:[#allocation2 + $0x1] sm:$0x1]  ;;  %v94_v4 = vld [vmem:[#allocation2 + $0x5] sm:$0x1]  ;;  %s216_s27 = sld [smem:[#allocation6 + $0x5]] }
  0x24   :  { %v97_v6 = vrot.slane %v94_v4, 7  ;;  %v125_v7 = vld [vmem:[#allocation2 + $0x6] sm:$0x1]  ;;  %s219_s28 = sld [smem:[#allocation6 + $0x6]]  ;;  %s298_s29 = smov 1   ;;  %v40_v37 = vand.u32 127, %v39_v36 }
  0x25   :  { %v67_v5 = vsel %vm66_vm0, %v65_v2, %v61_v0  ;;  %v128_v9 = vrot.slane %v125_v7, 7  ;;  %v156_v10 = vld [vmem:[#allocation2 + $0x7] sm:$0x1]  ;;  %s222_s30 = sld [smem:[#allocation6 + $0x7]]  ;;  %v124_v11 = vld [vmem:[#allocation2 + $0x2] sm:$0x1] }
  0x26   :  { %69 = vrot.lane.b32.xlu0 %v67_v5, %s298_s29  ;;  %v98_v8 = vsel %vm66_vm0, %v97_v6, %v93_v3  ;;  %s299_s3 = smov 127   ;;  %v159_v16 = vrot.slane %v156_v10, 7  ;;  %v155_v24 = vld [vmem:[#allocation2 + $0x3] sm:$0x1]  ;;  %v45_v38 = vand.u32 15, %v40_v37  ;;  %s75_s4 = sld [smem:[#allocation6]] }
  0x27   :  { %100 = vrot.lane.b32.xlu1 %v98_v8, %s298_s29  ;;  %v129_v19 = vsel %vm66_vm0, %v128_v9, %v124_v11  ;;  %s214_s5 = sld [smem:[#allocation6 + $0x8]]  ;;  %s215_s6 = sld [smem:[#allocation6 + $0x1]]  ;;  %v300_v39 = vmov 0.0  }
  0x28   :  { %v80_v12 = vstv %s213_s0  ;;  %v160_v31 = vsel %vm66_vm0, %v159_v16, %v155_v24  ;;  %vm53_vm1 = vcmp.ne.s32.totalorder %v45_v38, 0  ;;  %vm56_vm2 = vcmp.ne.s32.totalorder %v45_v38, 15  ;;  %s217_s7 = sld [smem:[#allocation6 + $0x9]]  ;;  %s218_s8 = sld [smem:[#allocation6 + $0x2]] }
  0x29   :  { %v81_v13 = vmul.f32 %v80_v12, %v61_v0  ;;  %v82_v14 = vmul.f32 %v80_v12, %v62_v1  ;;  %v111_v15 = vstv %s216_s27  ;;  %v209_v40 = vsel %vm53_vm1, 1.0, %v300_v39  ;;  %s220_s9 = sld [smem:[#allocation6 + $0xa]]  ;;  %s221_s10 = sld [smem:[#allocation6 + $0x3]] }
  0x2a   :  { %72 = vrot.lane.b32.xlu0 %v67_v5, %s299_s3  ;;  %v112_v17 = vmul.f32 %v111_v15, %v93_v3  ;;  %v113_v18 = vmul.f32 %v111_v15, %v94_v4  ;;  %v142_v20 = vstv %s219_s28  ;;  %v210_v44 = vsel %vm56_vm2, 1.0, %v300_v39  ;;  %s223_s11 = sld [smem:[#allocation6 + $0xb]]  ;;  %s211_s12 = sld [smem:[#allocation6 + $0xc]] }
  0x2b   :  { %v85_v21 = vrot.slane %v82_v14, 7  ;;  %103 = vrot.lane.b32.xlu1 %v98_v8, %s299_s3  ;;  %v143_v22 = vmul.f32 %v142_v20, %v124_v11  ;;  %v144_v23 = vmul.f32 %v142_v20, %v125_v7  ;;  %v173_v26 = vstv %s222_s30  ;;  %s212_s13 = sld [smem:[#allocation6 + $0xd]]  ;;  %s301_s14 = smov [#allocation7]  }
  0x2c   :  { %v116_v25 = vrot.slane %v113_v18, 7  ;;  %v174_v28 = vmul.f32 %v173_v26, %v155_v24  ;;  %v175_v29 = vmul.f32 %v173_v26, %v156_v10  ;;  %v76_v41 = vstv %s75_s4  ;;  %s199_s15 = sshll.u32 %s301_s14, 4  ;;  %s200_s15 = int_to_ptr.vmem [resolvable:$true] %s199_s15 }
  0x2d   :  { %v147_v27 = vrot.slane %v144_v23, 7  ;;  %v86_v30 = vsel %vm66_vm0, %v85_v21, %v81_v13  ;;  %v90_v48 = vstv %s214_s5  ;;  %v107_v50 = vstv %s215_s6  ;;  %s266_s16 = scalar_lea.vmem %s200_s15, 32  ;;  %p271_p0 = scmp.lt.s32.totalorder %s200_s15, %s200_s15 }
  0x2e   :  { %131 = vrot.lane.b32.xlu0 %v129_v19, %s298_s29  ;;  %v117_v32 = vsel %vm66_vm0, %v116_v25, %v112_v17  ;;  %v178_v33 = vrot.slane %v175_v29, 7  ;;  %v121_v57 = vstv %s217_s7  ;;  %v138_v61 = vstv %s218_s8  ;;  %p267_p13 = scmp.ne.s32.totalorder %s200_s15, %s266_s16  ;;  %p272_p1 = scmp.lt.s32.totalorder %s266_s16, %s266_s16 }
  0x2f   :  { %134 = vrot.lane.b32.xlu1 %v129_v19, %s299_s3  ;;  %v148_v34 = vsel %vm66_vm0, %v147_v27, %v143_v22  ;;  %v152_v5 = vstv %s220_s9  ;;  %v169_v8 = vstv %s221_s10 }
  0x30   :  { %v179_v35 = vsel %vm66_vm0, %v178_v33, %v174_v28  ;;  %v183_v15 = vstv %s223_s11  ;;  %v186_v20 = vstv %s211_s12  ;;  %p273_p2 = por %p272_p1, %p271_p0 }
  0x31   :  { %v189_v22 = vstv %s212_s13 }
  0x32   :  { %162 = vrot.lane.b32.xlu0 %v160_v31, %s298_s29  ;;  %p274_p3 = pnand %p273_p2, %p267_p13 }
  0x33   :  { %165 = vrot.lane.b32.xlu1 %v160_v31, %s299_s3 }
  0x98   :  { %v70_v42 = vpop.permute.xlu0 %69 }
  0x99   :  { %v71_v43 = vmul.f32 %v209_v40, %v70_v42  ;;  %v101_v45 = vpop.permute.xlu1 %100 }
  0x9a   :  { %v102_v47 = vmul.f32 %v209_v40, %v101_v45 }
  0x9b   :  { %v77_v46 = vmul.f32 %v76_v41, %v71_v43 }
  0x9c   :  { %v73_v49 = vpop.permute.xlu0 %72  ;;  %v108_v55 = vmul.f32 %v107_v50, %v102_v47 }
  0x9d   :  { %v74_v51 = vmul.f32 %v210_v44, %v73_v49  ;;  %v104_v52 = vpop.permute.xlu1 %103  ;;  %v88_v53 = vadd.f32 %v86_v30, %v77_v46 }
  0x9e   :  { %v105_v56 = vmul.f32 %v210_v44, %v104_v52 }
  0x9f   :  { %v91_v54 = vmul.f32 %v90_v48, %v74_v51 }
  0xa0   :  { %v132_v58 = vpop.permute.xlu0 %131  ;;  %v122_v0 = vmul.f32 %v121_v57, %v105_v56 }
  0xa1   :  { %v92_v59 = vadd.f32 %v91_v54, %v88_v53  ;;  %v133_v60 = vmul.f32 %v209_v40, %v132_v58  ;;  %v135_v62 = vpop.permute.xlu1 %134 }
  0xa2   :  { %v136_v4 = vmul.f32 %v210_v44, %v135_v62 }
  0xa3   :  { %v109_v63 = vadd.f32 %v108_v55, %v92_v59  ;;  %v139_v3 = vmul.f32 %v138_v61, %v133_v60 }
  0xa4   :  { %v163_v1 = vpop.permute.xlu0 %162  ;;  %v153_v11 = vmul.f32 %v152_v5, %v136_v4 }
  0xa5   :  { %v119_v2 = vadd.f32 %v117_v32, %v109_v63  ;;  %v164_v7 = vmul.f32 %v209_v40, %v163_v1  ;;  %v166_v9 = vpop.permute.xlu1 %165 }
  0xa6   :  { %v167_v14 = vmul.f32 %v210_v44, %v166_v9 }
  0xa7   :  { %v123_v6 = vadd.f32 %v122_v0, %v119_v2  ;;  %v170_v13 = vmul.f32 %v169_v8, %v164_v7 }
  0xa8   :  { %v184_v18 = vmul.f32 %v183_v15, %v167_v14 }
  0xa9   :  { %v140_v10 = vadd.f32 %v139_v3, %v123_v6 }
  0xab   :  { %v150_v12 = vadd.f32 %v148_v34, %v140_v10 }
  0xad   :  { %v154_v16 = vadd.f32 %v153_v11, %v150_v12 }
  0xaf   :  { %v171_v17 = vadd.f32 %v170_v13, %v154_v16 }
  0xb1   :  { %v181_v19 = vadd.f32 %v179_v35, %v171_v17 }
  0xb3   :  { %v185_v21 = vadd.f32 %v184_v18, %v181_v19 }
  0xb5   :  { %v187_v23 = vadd.f32 %v186_v20, %v185_v21 }
  0xb7   :  { %vm188_vm3 = vcmp.gt.f32.partialorder %v187_v23, 0.0  ;;  %v190_v24 = vmul.f32 %v189_v22, %v187_v23 }
  0xb9   :  { %v191_v25 = vsel %vm188_vm3, %v187_v23, %v190_v24 }
  0xba   :  { %192 = vst [vmem:[#allocation7] sm:$0x3] %v191_v25 }
  0xbb   :  { %277 = shalt.err (!%p274_p3)
}
  0xbc   :  { %s278_s19 = scalar_lea.hbm %s358_s2, 32 }
  0xbd   :  { %p279_p4 = scmp.ne.s32.totalorder %s358_s2, %s278_s19  ;;  %p282_p5 = scmp.lt.u32.totalorder %s278_s19, %s358_s2 }
  0xbf   :  { %p284_p6 = pnand %p282_p5, %p279_p4 }
  0xc1   :  { %287 = shalt.err (!%p284_p6)
}
  0xc2   :  { %202 = dma.vmem_to_hbm [thread:$0]  %s200_s15, 32, %s358_s2, [#allocation4]  }
  0xc3   :  { %292 = dma.done.wait [#allocation4], 32  }
  0xc4   :  { %293 = vsyncadd [#allocation4], 4294967264 }
  0xc5   :  { %206 = vsyncpa [#allocation3], 1 }
  0xc6   :  { %207 = vsyncpa [#allocation4], 1 }
  0xc7   :  { %208 = vsyncpa [#allocation5], 1 }

</bundles_post_ra>
